<compile_context>
chip_gen: v6e
topology: v6e:2x2x1
jax: 0.10.0
libtpu: 0.0.40
codegen_flags: <defaults>
</compile_context>

<pallas_src>
import functools

import jax
import jax.numpy as jnp
from jax.experimental import pallas as pl
from jax.experimental.pallas import tpu as pltpu


_NEG = -1e30  # bias for padded class columns -> exp() underflows to 0 in the softmax


def _round_up(a, b):
    return (a + b - 1) // b * b


def _cdiv(a, b):
    return -(-a // b)


def _vmem_budget_bytes():
    """~75% of this generation's physical VMEM (64 MiB on v7x, 128 MiB on v5e/v6e)."""
    try:
        cap = int(pltpu.get_tpu_info().vmem_capacity_bytes)
    except Exception:
        cap = 64 << 20  # conservative fallback (v7x-sized)
    return int(cap * 0.75)


def _pick_tc(C):
    """Channel-chunk size: must divide C exactly (the pooled sum reduces over it, so a
    ragged channel block would corrupt results) and be a multiple of 16 (bf16-safe
    sublane tiling for the conv-weight block)."""
    if C <= 256:
        return C
    for step in (16, 8):
        for tc in range(256, step - 1, -step):
            if tc % step == 0 and C % tc == 0:
                return tc
    return C


def _aux_kernel(x_ref, wc_ref, bc_ref, w1_ref, b1_ref, w2_ref, b2_ref,
                out_ref, acc_ref, *, inv_hw):
    c = pl.program_id(1)

    @pl.when(c == 0)
    def _init():
        acc_ref[...] = jnp.zeros_like(acc_ref)

    # Global average pool, channel chunk: f32 sum over the (full) spatial axis.
    # 1/HW is folded into the conv1 weights at prep time (inv_hw == 1.0 then).
    x = x_ref[...].astype(jnp.float32)                  # (TN, TC, hw)
    pooled = jnp.sum(x, axis=-1)                        # (TN, TC) f32
    if inv_hw != 1.0:
        pooled = pooled * inv_hw

    # Partial 1x1-conv (== linear) contribution of this channel chunk; f32 accumulate.
    acc_ref[...] += jnp.dot(pooled.astype(jnp.bfloat16), wc_ref[...],
                            preferred_element_type=jnp.float32)

    @pl.when(c == pl.num_programs(1) - 1)
    def _epilogue():
        # conv1 bias + ReLU
        h = jnp.maximum(acc_ref[...] + bc_ref[...], 0.0)

        # flatten is a no-op on (TN, OC); dropout(p=0.4) is identity in eval mode.
        # TODO(synk): training-mode dropout (stochastic mask via pltpu.prng_*) not implemented.

        # fc1 + ReLU
        h = jnp.dot(h.astype(jnp.bfloat16), w1_ref[...],
                    preferred_element_type=jnp.float32) + b1_ref[...]
        h = jnp.maximum(h, 0.0)

        # fc2 + LogSoftmax(dim=-1).  Padded class columns carry a -1e30 bias so they
        # contribute nothing to the normalizer; they are sliced off in the wrapper.
        logits = jnp.dot(h.astype(jnp.bfloat16), w2_ref[...],
                         preferred_element_type=jnp.float32) + b2_ref[...]
        m = jnp.max(logits, axis=-1, keepdims=True)
        z = logits - m
        lse = jnp.log(jnp.sum(jnp.exp(z), axis=-1, keepdims=True))
        out_ref[...] = z - lse


def prepare_params(params, in_channels, spatial_hw=None):
    """One-time weight preprocessing (hoisted out of the per-call forward).

    conv weight (out_ch, in_ch, 1, 1) -> (in_ch, out_ch) bf16 with 1/HW folded in when
    the spatial size is known; linear weights (out, in) -> (in, out) bf16; fc2 weight and
    bias padded to a 128-multiple class dim (padded biases = -1e30).
    """
    oc = params["conv1_w"].shape[0]
    nc = params["fc2_w"].shape[0]
    ncp = _round_up(nc, 128)

    wc = jnp.transpose(params["conv1_w"].reshape(oc, in_channels)).astype(jnp.float32)
    if spatial_hw:
        wc = wc * (1.0 / float(spatial_hw))   # fold the average-pool 1/HW into conv1
    wc = wc.astype(jnp.bfloat16)

    bc = params["conv1_b"].astype(jnp.float32).reshape(1, oc)
    w1 = jnp.transpose(params["fc1_w"]).astype(jnp.bfloat16)
    b1 = params["fc1_b"].astype(jnp.float32).reshape(1, oc)
    w2 = jnp.pad(jnp.transpose(params["fc2_w"]).astype(jnp.bfloat16),
                 ((0, 0), (0, ncp - nc)))
    b2 = jnp.pad(params["fc2_b"].astype(jnp.float32), (0, ncp - nc),
                 constant_values=_NEG).reshape(1, ncp)

    return {"wc": wc, "bc": bc, "w1": w1, "b1": b1, "w2": w2, "b2": b2,
            "num_classes": nc, "pool_hw": spatial_hw}


def inception_aux_forward(x_nchw, prepared):
    """x_nchw: (N, C, H, W) float32 or bfloat16. Returns (N, num_classes) log-probs."""
    N, C, H, W = x_nchw.shape
    hw = H * W
    nc = prepared["num_classes"]
    ncp = prepared["w2"].shape[1]          # lane-dense output / class padding
    oc = prepared["wc"].shape[1]

    # 1/HW is folded into the conv weights iff the spatial size matched at prep time.
    inv_hw = 1.0 if prepared.get("pool_hw") == hw else 1.0 / float(hw)

    # (N, C, H, W) -> (N, C, H*W): contiguous collapse, no HBM copy.  No hw padding:
    # the kernel block's last dim equals the full hw (legal even when hw % 128 != 0).
    x3 = x_nchw.reshape(N, C, hw)
    Neff = N
    if Neff < 8:                           # only the degenerate tiny-batch case is padded
        x3 = jnp.pad(x3, ((0, 8 - Neff), (0, 0), (0, 0)))
        Neff = 8
    x_itemsize = jnp.dtype(x3.dtype).itemsize

    weights = (prepared["wc"], prepared["bc"], prepared["w1"],
               prepared["b1"], prepared["w2"], prepared["b2"])

    # ---- per-generation VMEM budget and tile sizing --------------------------------
    budget = _vmem_budget_bytes()
    TC = _pick_tc(C)                                         # channel chunk (divides C)
    resident_bytes = sum(int(w.size) * w.dtype.itemsize for w in weights[1:])
    wc_block_bytes = TC * oc * 2                             # bf16 conv-weight chunk
    fixed = 2 * (resident_bytes + wc_block_bytes)            # default 2-deep buffering
    slack = 2 << 20                                          # epilogue temporaries etc.
    # double-buffered x tile (+ an f32 working copy when x is sub-32-bit) + out tile + acc
    per_elem = 2 * x_itemsize + (4 if x_itemsize < 4 else 0)
    per_row = TC * hw * per_elem + 2 * ncp * 4 + oc * 4
    tn_budget = max((budget - fixed - slack) // per_row, 8)

    TN = int(min(256, tn_budget))
    TN = max((TN // 8) * 8, 8)
    # v7x megacore: guarantee >=2 steps on the "parallel" batch axis when the batch allows.
    if Neff > 8 and Neff <= TN:
        TN = max(_round_up(_cdiv(Neff, 2), 8), 8)
    # never let a block extend past the array's first dim except as a ragged tail
    TN = min(TN, max((Neff // 8) * 8, 8))

    grid = (_cdiv(Neff, TN), C // TC)
    vmem_limit = int(min(max(budget, 32 << 20), 100 << 20))

    def _const_spec(shape):
        nd = len(shape)
        return pl.BlockSpec(shape, lambda i, c, _nd=nd: (0,) * _nd)

    in_specs = [
        pl.BlockSpec((TN, TC, hw), lambda i, c: (i, c, 0)),   # x: streamed per (batch, channel) chunk
        pl.BlockSpec((TC, oc), lambda i, c: (c, 0)),          # conv1 weight chunk
        _const_spec(prepared["bc"].shape),
        _const_spec(prepared["w1"].shape),
        _const_spec(prepared["b1"].shape),
        _const_spec(prepared["w2"].shape),
        _const_spec(prepared["b2"].shape),
    ]
    out_specs = pl.BlockSpec((TN, ncp), lambda i, c: (i, 0))  # resident across the C axis

    out = pl.pallas_call(
        functools.partial(_aux_kernel, inv_hw=inv_hw),
        out_shape=jax.ShapeDtypeStruct((Neff, ncp), jnp.float32),
        grid=grid,
        in_specs=in_specs,
        out_specs=out_specs,
        scratch_shapes=[pltpu.VMEM((TN, oc), jnp.float32)],   # pooled@Wc accumulator
        compiler_params=pltpu.CompilerParams(
            dimension_semantics=("parallel", "arbitrary"),
            vmem_limit_bytes=vmem_limit),
    )(x3, *weights)

    # Ragged last batch tile may contain garbage rows; they are discarded here.  No
    # in-kernel reduction crosses the batch axis, so this is safe by construction.
    return out[:N, :nc]


def init_params(key, in_channels, out_channels, num_classes):
    ks = jax.random.split(key, 6)

    def u(k, shape, fan_in):
        bound = 1.0 / jnp.sqrt(fan_in)
        return jax.random.uniform(k, shape, jnp.float32, -bound, bound)

    return {
        "conv1_w": u(ks[0], (out_channels, in_channels, 1, 1), in_channels),
        "conv1_b": u(ks[1], (out_channels,), in_channels),
        "fc1_w":   u(ks[2], (out_channels, out_channels), out_channels),
        "fc1_b":   u(ks[3], (out_channels,), out_channels),
        "fc2_w":   u(ks[4], (num_classes, out_channels), out_channels),
        "fc2_b":   u(ks[5], (num_classes,), out_channels),
    }


if __name__ == "__main__":
    # small shapes consistent with the module
    N, C, H, W = 2, 4, 16, 16
    out_channels, num_classes = 8, 32

    key = jax.random.PRNGKey(0)
    kx, kp = jax.random.split(key)
    x = jax.random.normal(kx, (N, C, H, W), jnp.float32)
    params = init_params(kp, C, out_channels, num_classes)

    prepared = prepare_params(params, C, spatial_hw=H * W)  # one-time weight prep
    out = inception_aux_forward(x, prepared)
    out = jax.block_until_ready(out)

    # sanity check against a pure-JAX f32 reference of the same forward pass
    # (kernel matmuls run in bf16 -> tolerance loosened accordingly)
    pooled = jnp.mean(x, axis=(2, 3))
    h = jnp.maximum(pooled @ params["conv1_w"].reshape(out_channels, C).T
                    + params["conv1_b"], 0.0)
    h = jnp.maximum(h @ params["fc1_w"].T + params["fc1_b"], 0.0)
    logits = h @ params["fc2_w"].T + params["fc2_b"]
    ref = jax.nn.log_softmax(logits, axis=-1)

    assert out.shape == (N, num_classes)
    assert bool(jnp.all(jnp.isfinite(out)))
    assert jnp.allclose(out, ref, atol=2e-2, rtol=2e-2), "mismatch vs reference"

    print("KERNEL_OK")
</pallas_src>

<mosaic_0001>
module attributes {stable_mosaic.version = 11 : i64} {
  func.func @_aux_kernel(%arg0: i32, %arg1: i32, %arg2: memref<8x4x256xf32, #tpu.memory_space<vmem>>, %arg3: memref<4x8xbf16, #tpu.memory_space<vmem>>, %arg4: memref<1x8xf32, #tpu.memory_space<vmem>>, %arg5: memref<8x8xbf16, #tpu.memory_space<vmem>>, %arg6: memref<1x8xf32, #tpu.memory_space<vmem>>, %arg7: memref<8x128xbf16, #tpu.memory_space<vmem>>, %arg8: memref<1x128xf32, #tpu.memory_space<vmem>>, %arg9: memref<8x128xf32, #tpu.memory_space<vmem>>, %arg10: memref<8x8xf32, #tpu.memory_space<vmem>>) attributes {dimension_semantics = [#tpu.dimension_semantics<parallel>, #tpu.dimension_semantics<arbitrary>], iteration_bounds = array<i64: 1, 1>, scalar_prefetch = 0 : i64, scratch_operands = 1 : i64, tpu.core_type = #tpu.core_type<tc>, window_params = [{transform_indices = @transform_0, window_bounds = array<i64: 8, 4, 256>}, {transform_indices = @transform_1, window_bounds = array<i64: 4, 8>}, {pipeline_mode = #tpu.pipeline_mode<synchronous>, transform_indices = @transform_2, window_bounds = array<i64: 1, 8>}, {pipeline_mode = #tpu.pipeline_mode<synchronous>, transform_indices = @transform_3, window_bounds = array<i64: 8, 8>}, {pipeline_mode = #tpu.pipeline_mode<synchronous>, transform_indices = @transform_4, window_bounds = array<i64: 1, 8>}, {pipeline_mode = #tpu.pipeline_mode<synchronous>, transform_indices = @transform_5, window_bounds = array<i64: 8, 128>}, {pipeline_mode = #tpu.pipeline_mode<synchronous>, transform_indices = @transform_6, window_bounds = array<i64: 1, 128>}, {transform_indices = @transform_7, window_bounds = array<i64: 8, 128>}]} {
    %c0_i32 = arith.constant 0 : i32
    %0 = arith.cmpi eq, %arg1, %c0_i32 : i32
    %1 = arith.extui %0 : i1 to i32
    %c0_i32_0 = arith.constant 0 : i32
    %2 = arith.cmpi ne, %1, %c0_i32_0 : i32
    scf.if %2 {
      %cst_12 = arith.constant 0.000000e+00 : f32
      %14 = vector.broadcast %cst_12 : f32 to vector<8x8xf32>
      %c0_13 = arith.constant 0 : index
      %c0_14 = arith.constant 0 : index
      %15 = vector.load %arg10[%c0_13, %c0_14] : memref<8x8xf32, #tpu.memory_space<vmem>>, vector<8x8xf32>
      tpu.vector_store %arg10[%c0_13, %c0_14], %14 {strides = array<i32>} : memref<8x8xf32, #tpu.memory_space<vmem>>, vector<8x8xf32>,
    } else {
    }
    %c0 = arith.constant 0 : index
    %c0_1 = arith.constant 0 : index
    %c0_2 = arith.constant 0 : index
    %3 = vector.load %arg2[%c0, %c0_1, %c0_2] : memref<8x4x256xf32, #tpu.memory_space<vmem>>, vector<8x4x256xf32>
    %cst = arith.constant dense<0.000000e+00> : vector<8x4xf32>
    %4 = vector.multi_reduction <add>, %3, %cst [2] : vector<8x4x256xf32> to vector<8x4xf32>
    %c0_3 = arith.constant 0 : index
    %c0_4 = arith.constant 0 : index
    %5 = vector.load %arg10[%c0_3, %c0_4] : memref<8x8xf32, #tpu.memory_space<vmem>>, vector<8x8xf32>
    %6 = arith.truncf %4 : vector<8x4xf32> to vector<8x4xbf16>
    %c0_5 = arith.constant 0 : index
    %c0_6 = arith.constant 0 : index
    %7 = vector.load %arg3[%c0_5, %c0_6] : memref<4x8xbf16, #tpu.memory_space<vmem>>, vector<4x8xbf16>
    %cst_7 = arith.constant dense<0.000000e+00> : vector<8x8xf32>
    %8 = tpu.matmul %6, %7, %cst_7 {dimension_numbers = #tpu.dot_dimension_numbers<[1], [0], [0], [1], [0, 0, 1, 1], [], []>} : vector<8x4xbf16>, vector<4x8xbf16>, vector<8x8xf32> -> vector<8x8xf32>
    %9 = arith.addf %5, %8 : vector<8x8xf32>
    %c0_8 = arith.constant 0 : index
    %c0_9 = arith.constant 0 : index
    %10 = vector.load %arg10[%c0_8, %c0_9] : memref<8x8xf32, #tpu.memory_space<vmem>>, vector<8x8xf32>
    tpu.vector_store %arg10[%c0_8, %c0_9], %9 {strides = array<i32>} : memref<8x8xf32, #tpu.memory_space<vmem>>, vector<8x8xf32>,
    %c0_i32_10 = arith.constant 0 : i32
    %11 = arith.cmpi eq, %arg1, %c0_i32_10 : i32
    %12 = arith.extui %11 : i1 to i32
    %c0_i32_11 = arith.constant 0 : i32
    %13 = arith.cmpi ne, %12, %c0_i32_11 : i32
    scf.if %13 {
      %c0_12 = arith.constant 0 : index
      %c0_13 = arith.constant 0 : index
      %14 = vector.load %arg10[%c0_12, %c0_13] : memref<8x8xf32, #tpu.memory_space<vmem>>, vector<8x8xf32>
      %c0_14 = arith.constant 0 : index
      %c0_15 = arith.constant 0 : index
      %15 = vector.load %arg4[%c0_14, %c0_15] : memref<1x8xf32, #tpu.memory_space<vmem>>, vector<1x8xf32>
      %16 = vector.broadcast %15 : vector<1x8xf32> to vector<8x8xf32>
      %17 = arith.addf %14, %16 : vector<8x8xf32>
      %cst_16 = arith.constant 0.000000e+00 : f32
      %18 = vector.broadcast %cst_16 : f32 to vector<8x8xf32>
      %19 = arith.maximumf %17, %18 : vector<8x8xf32>
      %20 = arith.truncf %19 : vector<8x8xf32> to vector<8x8xbf16>
      %c0_17 = arith.constant 0 : index
      %c0_18 = arith.constant 0 : index
      %21 = vector.load %arg5[%c0_17, %c0_18] : memref<8x8xbf16, #tpu.memory_space<vmem>>, vector<8x8xbf16>
      %cst_19 = arith.constant dense<0.000000e+00> : vector<8x8xf32>
      %22 = tpu.matmul %20, %21, %cst_19 {dimension_numbers = #tpu.dot_dimension_numbers<[1], [0], [0], [1], [0, 0, 1, 1], [], []>} : vector<8x8xbf16>, vector<8x8xbf16>, vector<8x8xf32> -> vector<8x8xf32>
      %c0_20 = arith.constant 0 : index
      %c0_21 = arith.constant 0 : index
      %23 = vector.load %arg6[%c0_20, %c0_21] : memref<1x8xf32, #tpu.memory_space<vmem>>, vector<1x8xf32>
      %24 = vector.broadcast %23 : vector<1x8xf32> to vector<8x8xf32>
      %25 = arith.addf %22, %24 : vector<8x8xf32>
      %cst_22 = arith.constant 0.000000e+00 : f32
      %26 = vector.broadcast %cst_22 : f32 to vector<8x8xf32>
      %27 = arith.maximumf %25, %26 : vector<8x8xf32>
      %28 = arith.truncf %27 : vector<8x8xf32> to vector<8x8xbf16>
      %c0_23 = arith.constant 0 : index
      %c0_24 = arith.constant 0 : index
      %29 = vector.load %arg7[%c0_23, %c0_24] : memref<8x128xbf16, #tpu.memory_space<vmem>>, vector<8x128xbf16>
      %cst_25 = arith.constant dense<0.000000e+00> : vector<8x128xf32>
      %30 = tpu.matmul %28, %29, %cst_25 {dimension_numbers = #tpu.dot_dimension_numbers<[1], [0], [0], [1], [0, 0, 1, 1], [], []>} : vector<8x8xbf16>, vector<8x128xbf16>, vector<8x128xf32> -> vector<8x128xf32>
      %c0_26 = arith.constant 0 : index
      %c0_27 = arith.constant 0 : index
      %31 = vector.load %arg8[%c0_26, %c0_27] : memref<1x128xf32, #tpu.memory_space<vmem>>, vector<1x128xf32>
      %32 = vector.broadcast %31 : vector<1x128xf32> to vector<8x128xf32>
      %33 = arith.addf %30, %32 : vector<8x128xf32>
      %cst_28 = arith.constant dense<0xFF800000> : vector<8xf32>
      %34 = vector.multi_reduction <maximumf>, %33, %cst_28 [1] : vector<8x128xf32> to vector<8xf32>
      %35 = vector.shape_cast %34 : vector<8xf32> to vector<8x1xf32>
      %36 = vector.broadcast %35 : vector<8x1xf32> to vector<8x128xf32>
      %37 = arith.subf %33, %36 : vector<8x128xf32>
      %38 = math.exp %37 : vector<8x128xf32>
      %cst_29 = arith.constant dense<0.000000e+00> : vector<8xf32>
      %39 = vector.multi_reduction <add>, %38, %cst_29 [1] : vector<8x128xf32> to vector<8xf32>
      %40 = vector.shape_cast %39 : vector<8xf32> to vector<8x1xf32>
      %41 = math.log %40 : vector<8x1xf32>
      %42 = vector.broadcast %41 : vector<8x1xf32> to vector<8x128xf32>
      %43 = arith.subf %37, %42 : vector<8x128xf32>
      %c0_30 = arith.constant 0 : index
      %c0_31 = arith.constant 0 : index
      %44 = vector.load %arg9[%c0_30, %c0_31] : memref<8x128xf32, #tpu.memory_space<vmem>>, vector<8x128xf32>
      tpu.vector_store %arg9[%c0_30, %c0_31], %43 {strides = array<i32>} : memref<8x128xf32, #tpu.memory_space<vmem>>, vector<8x128xf32>,
    } else {
    }
    return
  }
  func.func @transform_0(%arg0: i32, %arg1: i32) -> (i32, i32, i32) {
    %c0_i32 = arith.constant 0 : i32
    %c0_i32_0 = arith.constant 0 : i32
    return %arg0, %arg1, %c0_i32 : i32, i32, i32
  }
  func.func @transform_1(%arg0: i32, %arg1: i32) -> (i32, i32) {
    %c0_i32 = arith.constant 0 : i32
    %c0_i32_0 = arith.constant 0 : i32
    return %arg1, %c0_i32 : i32, i32
  }
  func.func @transform_2(%arg0: i32, %arg1: i32) -> (i32, i32) {
    %c0_i32 = arith.constant 0 : i32
    %c0_i32_0 = arith.constant 0 : i32
    %c0_i32_1 = arith.constant 0 : i32
    return %c0_i32, %c0_i32_0 : i32, i32
  }
  func.func @transform_3(%arg0: i32, %arg1: i32) -> (i32, i32) {
    %c0_i32 = arith.constant 0 : i32
    %c0_i32_0 = arith.constant 0 : i32
    %c0_i32_1 = arith.constant 0 : i32
    return %c0_i32, %c0_i32_0 : i32, i32
  }
  func.func @transform_4(%arg0: i32, %arg1: i32) -> (i32, i32) {
    %c0_i32 = arith.constant 0 : i32
    %c0_i32_0 = arith.constant 0 : i32
    %c0_i32_1 = arith.constant 0 : i32
    return %c0_i32, %c0_i32_0 : i32, i32
  }
  func.func @transform_5(%arg0: i32, %arg1: i32) -> (i32, i32) {
    %c0_i32 = arith.constant 0 : i32
    %c0_i32_0 = arith.constant 0 : i32
    %c0_i32_1 = arith.constant 0 : i32
    return %c0_i32, %c0_i32_0 : i32, i32
  }
  func.func @transform_6(%arg0: i32, %arg1: i32) -> (i32, i32) {
    %c0_i32 = arith.constant 0 : i32
    %c0_i32_0 = arith.constant 0 : i32
    %c0_i32_1 = arith.constant 0 : i32
    return %c0_i32, %c0_i32_0 : i32, i32
  }
  func.func @transform_7(%arg0: i32, %arg1: i32) -> (i32, i32) {
    %c0_i32 = arith.constant 0 : i32
    %c0_i32_0 = arith.constant 0 : i32
    return %arg0, %c0_i32 : i32, i32
  }
}

</mosaic_0001>

<bundles_post_ra>
// kernel: tpu_custom_call.1
= control target key start
LH: loop header
LB: loop body
LE: loop exit
PB: predicated region body
PF: predicated region fallthrough
CT: control target
= control target key end

     0   :  { %12 = vsyncpa [#allocation4], 0  ;;  %s661_s0 = inlined_call_operand.hbm [shape: f32[8,4,256], index: 0, kind: input, shape index: {}]   ;;  %s662_s1 = inlined_call_operand.hbm [shape: bf16[4,8], index: 1, kind: input, shape index: {}]   ;;  %s663_s2 = inlined_call_operand.vmem [shape: f32[1,8], index: 2, kind: input, shape index: {}]   ;;  %s664_s3 = inlined_call_operand.vmem [shape: bf16[8,8], index: 3, kind: input, shape index: {}]   ;;  %s665_s4 = inlined_call_operand.hbm [shape: f32[1,8], index: 4, kind: input, shape index: {}]   ;;  %s666_s5 = inlined_call_operand.vmem [shape: bf16[8,128], index: 5, kind: input, shape index: {}]   ;;  %s667_s6 = inlined_call_operand.vmem [shape: f32[1,128], index: 6, kind: input, shape index: {}]   ;;  %s668_s7 = inlined_call_operand.hbm [shape: f32[8,128], index: 7, kind: output, shape index: {}]  }
   0x1   :  { %13 = vsyncpa [#allocation7], 0 }
   0x2   :  { %14 = vsyncpa [#allocation5], 0  ;;  %s557_s24 = smov [#allocation6]   ;;  %s558_s26 = smov [#allocation3]  }
   0x3   :  { %s33_s25 = sshll.u32 %s557_s24, 4  ;;  %s20_s27 = sshll.u32 %s558_s26, 4  ;;  %s34_s25 = int_to_ptr.vmem [resolvable:$true] %s33_s25  ;;  %s21_s27 = int_to_ptr.vmem [resolvable:$true] %s20_s27 }
   0x4   :  { %s479_s28 = scalar_lea.vmem %s34_s25, 32  ;;  %p484_p1 = scmp.lt.s32.totalorder %s34_s25, %s34_s25 }
   0x5   :  { %p480_p0 = scmp.ne.s32.totalorder %s34_s25, %s479_s28  ;;  %p485_p2 = scmp.lt.s32.totalorder %s479_s28, %s479_s28 }
   0x7   :  { %p486_p3 = por %p485_p2, %p484_p1 }
   0x9   :  { %p487_p4 = pnand %p486_p3, %p480_p0 }
   0xb   :  { %490 = shalt.err (!%p487_p4)
}
   0xc   :  { %36 = dma.hbm_to_vmem [thread:$0]  %s662_s1, 32, %s34_s25, [#allocation7]  }
   0xd   :  { %s499_s8 = scalar_lea.vmem %s21_s27, 1024  ;;  %p504_p6 = scmp.lt.s32.totalorder %s21_s27, %s21_s27 }
   0xe   :  { %p500_p5 = scmp.ne.s32.totalorder %s21_s27, %s499_s8  ;;  %p505_p7 = scmp.lt.s32.totalorder %s499_s8, %s499_s8 }
  0x10   :  { %p506_p8 = por %p505_p7, %p504_p6 }
  0x12   :  { %p507_p9 = pnand %p506_p8, %p500_p5 }
  0x14   :  { %510 = shalt.err (!%p507_p9)
}
  0x15   :  { %s559_s9 = smov 128   ;;  %s560_s10 = smov 8  }
  0x16   :  { %26 = dma.hbm_to_vmem [thread:$0]  %s661_s0, 1024, %s21_s27, [#allocation4], %s559_s9, %s559_s9, %s560_s10  }
  0x17   :  { %s561_s13 = smov [#allocation8]  }
  0x18   :  { %s47_s14 = sshll.u32 %s561_s13, 4  ;;  %s48_s14 = int_to_ptr.vmem [resolvable:$true] %s47_s14 }
  0x19   :  { %s519_s15 = scalar_lea.vmem %s48_s14, 16  ;;  %s523_s16 = scalar_lea.vmem %s48_s14, 32 }
  0x1a   :  { %p520_p10 = scmp.ne.s32.totalorder %s48_s14, %s519_s15  ;;  %p524_p11 = scmp.lt.s32.totalorder %s48_s14, %s48_s14 }
  0x1b   :  { %p525_p12 = scmp.lt.s32.totalorder %s523_s16, %s519_s15 }
  0x1d   :  { %p526_p13 = por %p525_p12, %p524_p11 }
  0x1f   :  { %p527_p0 = pnand %p526_p13, %p520_p10 }
  0x21   :  { %530 = shalt.err (!%p527_p0)
}
  0x22   :  { %50 = dma.hbm_to_vmem [thread:$0]  %s665_s4, 16, %s48_s14, [#allocation7]  }
  0x23   :  { %551 = dma.done.wait [#allocation4], 1024  }
  0x24   :  { %552 = vsyncadd [#allocation4], 4294966272 }
  0x25   :  { %553 = dma.done.wait [#allocation7], 48  }
  0x26   :  { %554 = vsyncadd [#allocation7], 4294967248  ;;  %vm103_vm0 = vcmask 1043456   ;;  %v71_v0 = vld [vmem:[#allocation3] sm:$0xff]  ;;  %v73_v1 = vld [vmem:[#allocation3 + $0x10] sm:$0xff]  ;;  %vm223_vm1 = vcmask 1041408   ;;  %v170_v43 = vlaneseq }
  0x27   :  { %v72_v2 = vld [vmem:[#allocation3 + $0x8] sm:$0xff]  ;;  %v87_v3 = vcombine.high %v71_v0, %v71_v0  ;;  %v104_v4 = vsel %vm103_vm0, %v71_v0, 0.0  ;;  %v89_v5 = vcombine.high %v73_v1, %v73_v1  ;;  %v114_v6 = vsel %vm103_vm0, %v73_v1, 0.0  ;;  %v74_v7 = vld [vmem:[#allocation3 + $0x18] sm:$0xff]  ;;  %v75_v8 = vld [vmem:[#allocation3 + $0x20] sm:$0xff] }
  0x28   :  { %v88_v9 = vcombine.high %v72_v2, %v72_v2  ;;  %v109_v10 = vsel %vm103_vm0, %v72_v2, 0.0  ;;  %v90_v11 = vcombine.high %v74_v7, %v74_v7  ;;  %v76_v12 = vld [vmem:[#allocation3 + $0x28] sm:$0xff]  ;;  %v119_v15 = vsel %vm103_vm0, %v74_v7, 0.0  ;;  %v77_v21 = vld [vmem:[#allocation3 + $0x30] sm:$0xff]  ;;  %v78_v22 = vld [vmem:[#allocation3 + $0x38] sm:$0xff] }
  0x29   :  { %v105_v13 = vsel %vm103_vm0, %v87_v3, 0.0  ;;  %v115_v14 = vsel %vm103_vm0, %v89_v5, 0.0  ;;  %v91_v16 = vcombine.high %v75_v8, %v75_v8  ;;  %v92_v23 = vcombine.high %v76_v12, %v76_v12  ;;  %v153_v40 = vld [vmem:[#allocation6] sm:$0x3] }
  0x2a   :  { %v106_v17 = vadd.f32 %v105_v13, %v104_v4  ;;  %v116_v18 = vadd.f32 %v115_v14, %v114_v6  ;;  %v110_v19 = vsel %vm103_vm0, %v88_v9, 0.0  ;;  %v120_v20 = vsel %vm103_vm0, %v90_v11, 0.0 }
  0x2b   :  { %v111_v24 = vadd.f32 %v110_v19, %v109_v10  ;;  %v121_v25 = vadd.f32 %v120_v20, %v119_v15  ;;  %v124_v26 = vsel %vm103_vm0, %v75_v8, 0.0  ;;  %v125_v27 = vsel %vm103_vm0, %v91_v16, 0.0 }
  0x2c   :  { %107 = vadd.xlane.f32.xlu0 %v106_v17  ;;  %117 = vadd.xlane.f32.xlu1 %v116_v18  ;;  %v129_v28 = vsel %vm103_vm0, %v76_v12, 0.0  ;;  %v130_v29 = vsel %vm103_vm0, %v92_v23, 0.0  ;;  %v93_v30 = vcombine.high %v77_v21, %v77_v21  ;;  %v94_v31 = vcombine.high %v78_v22, %v78_v22  ;;  %v284_v23 = vld [vmem:[%s664_s3] sm:$0xf] }
  0x2d   :  { %v126_v32 = vadd.f32 %v125_v27, %v124_v26  ;;  %v131_v33 = vadd.f32 %v130_v29, %v129_v28  ;;  %v134_v34 = vsel %vm103_vm0, %v77_v21, 0.0  ;;  %v139_v36 = vsel %vm103_vm0, %v78_v22, 0.0 }
  0x2e   :  { %v135_v35 = vsel %vm103_vm0, %v93_v30, 0.0  ;;  %v140_v37 = vsel %vm103_vm0, %v94_v31, 0.0  ;;  %v562_v41 = vmov 0.0   ;;  %v225_v42 = vsel %vm223_vm1, %v153_v40, 0 }
  0x2f   :  { %v136_v38 = vadd.f32 %v135_v35, %v134_v34  ;;  %v141_v39 = vadd.f32 %v140_v37, %v139_v36  ;;  %433 = vmatprep.subr.bf16.mxu0 %v562_v41  ;;  %439 = vmatprep.subr.bf16.mxu1 %v562_v41  ;;  %vm563_vm2 = vmmov 0   ;;  %vm69_vm3 = vcmask 64512  }
  0x30   :  { %112 = vadd.xlane.f32.xlu0 %v111_v24  ;;  %122 = vadd.xlane.f32.xlu1 %v121_v25  ;;  %70 = vst.msk [vmem:[#allocation2] sm:$0xff] %vm69_vm3, %v562_v41  ;;  %v171_v44 = vand.u32 127, %v170_v43  ;;  %v173_v45 = vshrl.u32 %v170_v43, 7  ;;  %vm204_vm4 = vcmask 1041409   ;;  %vm206_vm5 = vcmask 1042434  }
  0x31   :  { %434 = vmatpush3.bf16.msra.mxu0 %v225_v42  ;;  %435 = vmatprep.mubr.msk.bf16.mxu0 %vm563_vm2, %v562_v41  ;;  %vm208_vm6 = vcmask 1043459   ;;  %vm210_vm7 = vcmask 1044484   ;;  %vm212_vm8 = vcmask 1045509   ;;  %vm214_vm9 = vcmask 1046534   ;;  %v340_v25 = vld [vmem:[%s666_s5] sm:$0xf] }
  0x32   :  { %441 = vmatprep.mubr.msk.bf16.mxu1 %vm563_vm2, %v562_v41  ;;  %445 = vmatprep.subr.bf16.mxu0 %v562_v41  ;;  %v174_v50 = vsub.s32 %v171_v44, %v173_v45  ;;  %vm216_vm10 = vcmask 1047559   ;;  %vm219_vm11 = vcmask 31744   ;;  %v296_v24 = vsel %vm103_vm0, %v284_v23, 0 }
  0x33   :  { %440 = vmatpush3.bf16.msra.mxu1 %v296_v24  ;;  %v352_v26 = vsel %vm103_vm0, %v340_v25, 0 }
  0x34   :  { %127 = vadd.xlane.f32.xlu0 %v126_v32  ;;  %132 = vadd.xlane.f32.xlu1 %v131_v33  ;;  %v422_v33 = vld [vmem:[%s663_s2] ss:$0 sm:$0xff]  ;;  %s564_s2 = smov [#allocation9]  }
  0x35   :  { %s411_s22 = sshll.u32 %s564_s2, 4  ;;  %s412_s22 = int_to_ptr.vmem [resolvable:$true] %s411_s22 }
  0x36   :  { %p536_p2 = scmp.lt.s32.totalorder %s412_s22, %s412_s22 }
  0x37   :  { %v144_v27 = vld [vmem:[#allocation2] sm:$0xff] }
  0x38   :  { %137 = vadd.xlane.f32.xlu0 %v136_v38  ;;  %142 = vadd.xlane.f32.xlu1 %v141_v39  ;;  %v423_v38 = vld [vmem:[#allocation8] ss:$0 sm:$0xff] }
  0xb5   :  { %v108_v46 = vpop.xlane.xlu0 %107  ;;  %v118_v47 = vpop.xlane.xlu1 %117 }
  0xb6   :  { %v145_v48 = vpack.c.bf16 %v108_v46, %v108_v46  ;;  %v147_v49 = vpack.c.bf16 %v118_v47, %v118_v47  ;;  %v425_v46 = vld [vmem:[%s667_s6] ss:$0 sm:$0xff]  ;;  %s531_s6 = scalar_lea.vmem %s412_s22, 128 }
  0xb7   :  { %p532_p1 = scmp.ne.s32.totalorder %s412_s22, %s531_s6  ;;  %p537_p3 = scmp.lt.s32.totalorder %s531_s6, %s531_s6 }
  0xb8   :  { %v162_v51 = vunpack.c.l.b16 %v145_v48  ;;  %v164_v56 = vunpack.c.l.b16 %v147_v49 }
  0xb9   :  { %v113_v52 = vpop.xlane.xlu0 %112  ;;  %v123_v53 = vpop.xlane.xlu1 %122  ;;  %p538_p4 = por %p537_p3, %p536_p2 }
  0xba   :  { %v146_v54 = vpack.c.bf16 %v113_v52, %v113_v52  ;;  %v148_v55 = vpack.c.bf16 %v123_v53, %v123_v53  ;;  %v175_v59 = vrot.slane %v162_v51, %v174_v50  ;;  %v183_v2 = vrot.slane %v164_v56, %v174_v50 }
  0xbb   :  { %p539_p5 = pnand %p538_p4, %p532_p1 }
  0xbc   :  { %v163_v57 = vunpack.c.l.b16 %v146_v54  ;;  %v165_v58 = vunpack.c.l.b16 %v148_v55 }
  0xbd   :  { %v128_v60 = vpop.xlane.xlu0 %127  ;;  %v133_v61 = vpop.xlane.xlu1 %132 }
  0xbe   :  { %v179_v62 = vrot.slane %v163_v57, %v174_v50  ;;  %v187_v63 = vrot.slane %v165_v58, %v174_v50  ;;  %v149_v0 = vpack.c.bf16 %v128_v60, %v128_v60  ;;  %v150_v1 = vpack.c.bf16 %v133_v61, %v133_v61 }
  0xc0   :  { %v205_v3 = vsel %vm204_vm4, %v179_v62, %v175_v59  ;;  %v166_v4 = vunpack.c.l.b16 %v149_v0  ;;  %v167_v5 = vunpack.c.l.b16 %v150_v1 }
  0xc1   :  { %v207_v6 = vsel %vm206_vm5, %v183_v2, %v205_v3  ;;  %v138_v7 = vpop.xlane.xlu0 %137  ;;  %v143_v8 = vpop.xlane.xlu1 %142 }
  0xc2   :  { %v209_v9 = vsel %vm208_vm6, %v187_v63, %v207_v6  ;;  %v191_v10 = vrot.slane %v166_v4, %v174_v50  ;;  %v151_v11 = vpack.c.bf16 %v138_v7, %v138_v7  ;;  %v195_v12 = vrot.slane %v167_v5, %v174_v50 }
  0xc3   :  { %v152_v13 = vpack.c.bf16 %v143_v8, %v143_v8 }
  0xc4   :  { %v211_v14 = vsel %vm210_vm7, %v191_v10, %v209_v9  ;;  %v168_v15 = vunpack.c.l.b16 %v151_v11 }
  0xc5   :  { %v169_v16 = vunpack.c.l.b16 %v152_v13  ;;  %v213_v18 = vsel %vm212_vm8, %v195_v12, %v211_v14 }
  0xc6   :  { %v199_v17 = vrot.slane %v168_v15, %v174_v50 }
  0xc7   :  { %v203_v19 = vrot.slane %v169_v16, %v174_v50 }
  0xc8   :  { %v215_v20 = vsel %vm214_vm9, %v199_v17, %v213_v18 }
  0xc9   :  { %v217_v21 = vsel %vm216_vm10, %v203_v19, %v215_v20 }
  0xca   :  { %v218_v22 = vpack.c.b16 %v217_v21, %v217_v21 }
  0xcc   :  { %436 = vmatmul.mubr.msk.bf16.vlgmr.msra.gmra.mxu0 %vm219_vm11, %v218_v22 }
  0xcd   :  { %447 = vmatprep.mubr.msk.bf16.mxu0 %vm563_vm2, %v562_v41  ;;  %446 = vmatpush3.bf16.msra.mxu0 %v352_v26 }
 0x18c   :  { %v261_v28 = vpop.f32.mrf.mxu0 }
 0x18d   :  { %v267_v29 = vadd.f32 %v261_v28, %v144_v27 }
 0x18e   :  { %v437_v30 = vpop.f32.mrf.mxu0 }
 0x18f   :  { %269 = vst.msk [vmem:[#allocation2] sm:$0xff] %vm69_vm3, %v267_v29 }
 0x190   :  { %v264_v31 = vpop.f32.mrf.mxu0 }
 0x192   :  { %v438_v32 = vpop.f32.mrf.mxu0 }
 0x196   :  { %v273_v34 = vld [vmem:[#allocation2] sm:$0xff] }
 0x197   :  { %v281_v35 = vadd.f32 %v422_v33, %v273_v34 }
 0x199   :  { %v282_v36 = vmax.f32 %v281_v35, 0.0 }
 0x19b   :  { %v283_v37 = vpack.c.bf16 %v282_v36, %v282_v36 }
 0x19d   :  { %442 = vmatmul.mubr.msk.bf16.vlgmr.msra.gmra.mxu1 %vm69_vm3, %v283_v37 }
 0x25d   :  { %v332_v39 = vpop.f32.mrf.mxu1 }
 0x25e   :  { %v333_v40 = vadd.f32 %v423_v38, %v332_v39 }
 0x25f   :  { %v443_v41 = vpop.f32.mrf.mxu1 }
 0x260   :  { %v338_v42 = vmax.f32 %v333_v40, 0.0 }
 0x261   :  { %v335_v43 = vpop.f32.mrf.mxu1 }
 0x262   :  { %v339_v44 = vpack.c.bf16 %v338_v42, %v338_v42 }
 0x263   :  { %v444_v45 = vpop.f32.mrf.mxu1 }
 0x264   :  { %448 = vmatmul.mubr.msk.bf16.vlgmr.msra.gmra.mxu0 %vm69_vm3, %v339_v44 }
 0x324   :  { %v388_v47 = vpop.f32.mrf.mxu0 }
 0x325   :  { %v389_v48 = vadd.f32 %v425_v46, %v388_v47 }
 0x326   :  { %v449_v49 = vpop.f32.mrf.mxu0 }
 0x327   :  { %394 = vmax.xlane.f32.xlu0 %v389_v48 }
 0x328   :  { %v391_v50 = vpop.f32.mrf.mxu0 }
 0x32a   :  { %v450_v51 = vpop.f32.mrf.mxu0 }
 0x3b0   :  { %v395_v52 = vpop.xlane.xlu0 %394 }
 0x3b1   :  { %v396_v53 = vsub.f32 %v389_v48, %v395_v52 }
 0x3b3   :  { %v397_v54 = vmul.f32 1.442695, %v396_v53 }
 0x3b5   :  { %467 = vpow2.f32 %v397_v54 }
 0x3c2   :  { %v468_v55 = vpop.eup %467 }
 0x3c3   :  { %399 = vadd.xlane.f32.xlu1 %v468_v55 }
 0x44c   :  { %v400_v56 = vpop.xlane.xlu1 %399 }
 0x44d   :  { %469 = vlog2.f32 %v400_v56 }
 0x45a   :  { %v470_v57 = vpop.eup %469 }
 0x45b   :  { %v402_v58 = vmul.f32 0.6931472, %v470_v57 }
 0x45d   :  { %v403_v59 = vsub.f32 %v396_v53, %v402_v58 }
 0x45f   :  { %404 = vst [vmem:[#allocation9] sm:$0xff] %v403_v59 }
 0x460   :  { %542 = shalt.err (!%p539_p5)
}
 0x461   :  { %414 = dma.vmem_to_hbm [thread:$0]  %s412_s22, 128, %s668_s7, [#allocation5]  }
 0x462   :  { %555 = dma.done.wait [#allocation5], 128  }
 0x463   :  { %556 = vsyncadd [#allocation5], 4294967168 }
 0x464   :  { %418 = vsyncpa [#allocation4], 1 }
 0x465   :  { %419 = vsyncpa [#allocation7], 1 }
 0x466   :  { %420 = vsyncpa [#allocation5], 1 }

</bundles_post_ra>
